<compile_context>
chip_gen: v7x
topology: tpu7x:2x2x1
jax: 0.10.0
libtpu: 0.0.40
codegen_flags: <defaults>
</compile_context>

<pallas_src>
import functools

import jax
import jax.numpy as jnp
from jax.experimental import pallas as pl
from jax.experimental.pallas import tpu as pltpu

_LANE = 128
_MIB = 1024 * 1024


def _mlp_proj_kernel(x_ref, w_ref, b_ref, o_ref, *, compute_dtype):
    # x_ref: (C, TN) input dtype   w_ref: (C, E) bf16   b_ref: (1, E) f32
    # o_ref: (TN, E) out dtype
    # Cast x in-kernel (VPU slack is free in this mem-bound regime), then
    # contract on C (dim 0 of both operands) -> (TN, E); accumulate in f32.
    x = x_ref[...].astype(compute_dtype)
    acc = jax.lax.dot_general(
        x,
        w_ref[...],
        dimension_numbers=(((0,), (0,)), ((), ())),
        preferred_element_type=jnp.float32,
    )
    o_ref[...] = (acc + b_ref[...]).astype(o_ref.dtype)


def _default_vmem_budget():
    """Per-chip VMEM budget for the tile picker (leaves compiler headroom)."""
    try:
        cap = int(pltpu.get_tpu_info().vmem_capacity_bytes)
        if cap <= 0:
            raise ValueError
    except Exception:
        cap = 64 * _MIB  # conservative fallback (v7x-sized)
    # ~half of physical, minus headroom: 128 MiB -> 56 MiB, 64 MiB -> 24 MiB.
    return max(min(cap // 2 - 8 * _MIB, 56 * _MIB), 16 * _MIB)


def _pick_tile_n(hw, c, e, batch, x_in_bytes, out_bytes, vmem_budget_bytes,
                 max_tile=4096):
    """Pick the HW tile: multiple-of-128 divisor of HW when possible, sized to
    the VMEM budget (including the f32 accumulator), balanced for 2 TCs."""
    if hw <= _LANE:
        return hw

    # VMEM model (bytes as a function of tile):
    #   x input  (double-buffered, native dtype): 2 * c * tile * x_in_bytes
    #   output   (double-buffered):               2 * tile * e * out_bytes
    #   weight+bias (grid-invariant, default double-buffer): 2*(c*e*2 + e*4)
    #   in-kernel temps: bf16 x cast (c*tile*2) + f32 acc (tile*e*4)
    #                    + output cast temp (tile*e*out_bytes)
    fixed = 2 * (c * e * 2 + e * 4)
    per_row = (2 * c * x_in_bytes + 2 * e * out_bytes
               + c * 2 + e * 4 + e * out_bytes)
    budget_tile = max((vmem_budget_bytes - fixed) // max(per_row, 1), _LANE)
    budget_tile = int(min(budget_tile, hw, max_tile))

    # Prefer the largest multiple-of-128 exact divisor of HW <= budget_tile:
    # no partial edge tile -> unmasked lane-dense stores, no OOB x reads.
    exact = 0
    for d in range(_LANE, budget_tile + 1, _LANE):
        if hw % d == 0:
            exact = d
    padded = max((budget_tile // _LANE) * _LANE, _LANE)
    # Only fall back to a masked (cdiv) edge tile if the exact divisor is
    # dramatically smaller than what the budget allows.
    tile = exact if exact >= max(padded // 4, _LANE) else padded

    # v7x megacore balance: both "parallel" axes shard across 2 TensorCores;
    # an odd total step count leaves one TC idle. Halve the tile when possible.
    n_tiles = -(-hw // tile)
    if (batch * n_tiles) % 2 == 1 and tile % (2 * _LANE) == 0:
        tile //= 2

    return int(tile)


def mlp_forward(x_nchw, weight, bias, *, compute_dtype=jnp.bfloat16,
                out_dtype=None, vmem_budget_bytes=None, max_tile=4096):
    """SegFormer MLP (linear embedding) forward.

    Args:
      x_nchw: (B, C, H, W) activations (any float dtype; cast in-kernel).
      weight: (C, E)  (already transposed vs. torch's (E, C)).
      bias:   (E,)
      compute_dtype: MXU operand dtype (bf16 halves HBM read of weights and is
        MXU-native; pass jnp.float32 for strict fp32-Linear parity).
      out_dtype: output dtype; defaults to compute_dtype (bf16) because the
        E-wide output write dominates HBM traffic.
    Returns:
      (B, H*W, E) in out_dtype.
    """
    B, C, H, W = x_nchw.shape
    Cw, E = weight.shape
    assert Cw == C, "weight must be (C, E)"
    HW = H * W
    out_dtype = out_dtype if out_dtype is not None else compute_dtype

    # Layout glue only: flatten(2) is a pure reshape in NCHW (no HBM transpose
    # pass); the logical (1,2) transpose is folded into the kernel's
    # transposed-LHS dot_general. x is NOT cast here (in-kernel cast instead).
    x_bchw = x_nchw.reshape(B, C, HW)
    w = weight.astype(compute_dtype)
    bias2d = bias.reshape(1, E).astype(jnp.float32)

    if vmem_budget_bytes is None:
        vmem_budget_bytes = _default_vmem_budget()

    x_in_bytes = jnp.dtype(x_bchw.dtype).itemsize
    out_bytes = jnp.dtype(out_dtype).itemsize
    tile_n = _pick_tile_n(HW, C, E, B, x_in_bytes, out_bytes,
                          vmem_budget_bytes, max_tile=max_tile)
    grid = (B, pl.cdiv(HW, tile_n))  # last HW tile may be partial (masked)

    kernel = functools.partial(_mlp_proj_kernel, compute_dtype=compute_dtype)

    out = pl.pallas_call(
        kernel,
        out_shape=jax.ShapeDtypeStruct((B, HW, E), out_dtype),
        grid_spec=pltpu.PrefetchScalarGridSpec(
            num_scalar_prefetch=0,
            grid=grid,
            in_specs=[
                # x: one batch row, full C, tile of HW (native NCHW layout).
                pl.BlockSpec((pl.Squeezed(), C, tile_n), lambda b, n: (b, 0, n)),
                # weight: grid-invariant full block (DMA'd once).
                pl.BlockSpec((C, E), lambda b, n: (0, 0)),
                # bias: grid-invariant.
                pl.BlockSpec((1, E), lambda b, n: (0, 0)),
            ],
            # Lane-dense output slab (full E on the lane axis).
            out_specs=pl.BlockSpec((pl.Squeezed(), tile_n, E),
                                   lambda b, n: (b, n, 0)),
        ),
        compiler_params=pltpu.CompilerParams(
            dimension_semantics=("parallel", "parallel"),
            # Coupled to the tile-picker budget (+ headroom) so a caller-raised
            # budget cannot exceed the compiler limit; stays within physical
            # VMEM on v5e/v6e (128 MiB) and v7x (64 MiB).
            vmem_limit_bytes=int(vmem_budget_bytes + 8 * _MIB),
        ),
    )(x_bchw, w, bias2d)

    return out


if __name__ == "__main__":
    # Small shapes consistent with the module: input_dim=C, embed_dim=E.
    B, C, H, W = 2, 32, 16, 16   # input_dim = 32, HW = 256
    E = 256                      # embed_dim = 256 (multiple of 128 -> lane-dense)

    key = jax.random.PRNGKey(0)
    kx, kw, kb = jax.random.split(key, 3)

    x = jax.random.normal(kx, (B, C, H, W), dtype=jnp.float32)
    # Deterministic synthetic parameters (not a checkpoint).
    weight = jax.random.normal(kw, (C, E), dtype=jnp.float32) * 0.02
    bias = jax.random.normal(kb, (E,), dtype=jnp.float32) * 0.02

    out = jax.block_until_ready(mlp_forward(x, weight, bias))

    # Reference: same math as torch Linear on flattened/transposed tokens (f32).
    x_tokens = jnp.transpose(x.reshape(B, C, H * W), (0, 2, 1))
    ref = x_tokens @ weight + bias

    assert out.shape == (B, H * W, E)
    assert out.dtype == jnp.bfloat16
    # bf16 operands/output + f32 accumulation -> bf16-class tolerance vs f32 ref.
    err = jnp.max(jnp.abs(out.astype(jnp.float32) - ref))
    assert jnp.allclose(out.astype(jnp.float32), ref, atol=3e-2, rtol=3e-2), float(err)

    print("KERNEL_OK")
</pallas_src>

<mosaic_0001>
module attributes {stable_mosaic.version = 11 : i64} {
  func.func @_mlp_proj_kernel(%arg0: i32, %arg1: i32, %arg2: memref<1x32x256xf32, #tpu.memory_space<vmem>>, %arg3: memref<32x256xbf16, #tpu.memory_space<vmem>>, %arg4: memref<1x256xf32, #tpu.memory_space<vmem>>, %arg5: memref<1x256x256xbf16, #tpu.memory_space<vmem>>) attributes {dimension_semantics = [#tpu.dimension_semantics<parallel>, #tpu.dimension_semantics<parallel>], iteration_bounds = array<i64: 2, 1>, scalar_prefetch = 0 : i64, scratch_operands = 0 : i64, tpu.core_type = #tpu.core_type<tc>, window_params = [{transform_indices = @transform_0, window_bounds = array<i64: 1, 32, 256>}, {pipeline_mode = #tpu.pipeline_mode<synchronous>, transform_indices = @transform_1, window_bounds = array<i64: 32, 256>}, {pipeline_mode = #tpu.pipeline_mode<synchronous>, transform_indices = @transform_2, window_bounds = array<i64: 1, 256>}, {transform_indices = @transform_3, window_bounds = array<i64: 1, 256, 256>}]} {
    %c0 = arith.constant 0 : index
    %c0_0 = arith.constant 0 : index
    %c0_1 = arith.constant 0 : index
    %0 = vector.load %arg2[%c0, %c0_0, %c0_1] : memref<1x32x256xf32, #tpu.memory_space<vmem>>, vector<1x32x256xf32>
    %1 = vector.shape_cast %0 : vector<1x32x256xf32> to vector<32x256xf32>
    %2 = arith.truncf %1 : vector<32x256xf32> to vector<32x256xbf16>
    %c0_2 = arith.constant 0 : index
    %c0_3 = arith.constant 0 : index
    %3 = vector.load %arg3[%c0_2, %c0_3] : memref<32x256xbf16, #tpu.memory_space<vmem>>, vector<32x256xbf16>
    %cst = arith.constant dense<0.000000e+00> : vector<256x256xf32>
    %4 = tpu.matmul %2, %3, %cst {dimension_numbers = #tpu.dot_dimension_numbers<[0], [0], [1], [1], [0, 1, 1, 1], [], []>} : vector<32x256xbf16>, vector<32x256xbf16>, vector<256x256xf32> -> vector<256x256xf32>
    %c0_4 = arith.constant 0 : index
    %c0_5 = arith.constant 0 : index
    %5 = vector.load %arg4[%c0_4, %c0_5] : memref<1x256xf32, #tpu.memory_space<vmem>>, vector<1x256xf32>
    %6 = vector.broadcast %5 : vector<1x256xf32> to vector<256x256xf32>
    %7 = arith.addf %4, %6 : vector<256x256xf32>
    %8 = arith.truncf %7 : vector<256x256xf32> to vector<256x256xbf16>
    %c0_6 = arith.constant 0 : index
    %c0_7 = arith.constant 0 : index
    %c0_8 = arith.constant 0 : index
    %9 = vector.load %arg5[%c0_6, %c0_7, %c0_8] : memref<1x256x256xbf16, #tpu.memory_space<vmem>>, vector<1x256x256xbf16>
    %10 = vector.shape_cast %9 : vector<1x256x256xbf16> to vector<256x256xbf16>
    %11 = vector.shape_cast %8 : vector<256x256xbf16> to vector<1x256x256xbf16>
    tpu.vector_store %arg5[%c0_6, %c0_7, %c0_8], %11 {strides = array<i32>} : memref<1x256x256xbf16, #tpu.memory_space<vmem>>, vector<1x256x256xbf16>,
    return
  }
  func.func @transform_0(%arg0: i32, %arg1: i32) -> (i32, i32, i32) {
    %c0_i32 = arith.constant 0 : i32
    %c0_i32_0 = arith.constant 0 : i32
    return %arg0, %c0_i32, %arg1 : i32, i32, i32
  }
  func.func @transform_1(%arg0: i32, %arg1: i32) -> (i32, i32) {
    %c0_i32 = arith.constant 0 : i32
    %c0_i32_0 = arith.constant 0 : i32
    %c0_i32_1 = arith.constant 0 : i32
    return %c0_i32, %c0_i32_0 : i32, i32
  }
  func.func @transform_2(%arg0: i32, %arg1: i32) -> (i32, i32) {
    %c0_i32 = arith.constant 0 : i32
    %c0_i32_0 = arith.constant 0 : i32
    %c0_i32_1 = arith.constant 0 : i32
    return %c0_i32, %c0_i32_0 : i32, i32
  }
  func.func @transform_3(%arg0: i32, %arg1: i32) -> (i32, i32, i32) {
    %c0_i32 = arith.constant 0 : i32
    %c0_i32_0 = arith.constant 0 : i32
    return %arg0, %arg1, %c0_i32 : i32, i32, i32
  }
}

</mosaic_0001>

<bundles_post_ra>
// kernel: tpu_custom_call.1
= control target key start
LH: loop header
LB: loop body
LE: loop exit
PB: predicated region body
PF: predicated region fallthrough
CT: control target
= control target key end

     0   :  { %8 = vsyncpa [#allocation3], 0  ;;  %s1612_s0 = inlined_call_operand.hbm [shape: f32[2,32,256], index: 0, kind: input, shape index: {}]   ;;  %s1613_s1 = inlined_call_operand.hbm [shape: bf16[32,256], index: 1, kind: input, shape index: {}]   ;;  %s1614_s2 = inlined_call_operand.vmem [shape: f32[1,256], index: 2, kind: input, shape index: {}]   ;;  %s1615_s3 = inlined_call_operand.hbm [shape: bf16[2,256,256], index: 3, kind: output, shape index: {}]  }
   0x1   :  { %10 = vsyncpa [#allocation3 + $0x1], 0 }
   0x2   :  { %11 = vsyncpa [#allocation6], 0 }
   0x3   :  { %12 = vsyncpa [#allocation4], 0 }
   0x4   :  { %14 = vsyncpa [#allocation4 + $0x1], 0  ;;  %s1254_s12 = smov 0   ;;  %s1256_s13 = smov 0  }
   0x5   :  { %s1258_s14 = smov 0   ;;  %s1260_s15 = smov 0  }
   0x6   :  { %s1262_s16 = smov 0   ;;  %s1264_s17 = smov 0  }
   0x7 LB: > { %s885_s18 = sadd.s32 4294967295, %s1222_s17   ;;  %s886_s19 = sadd.s32 4294967294, %s1222_s17   ;;  %s1222_s17 = sphi %s1264_s17, %s20_s17   ;;  %s1218_s16 = sphi %s1262_s16, %s1639_s16   ;;  %s1214_s15 = sphi %s1260_s15, %s1638_s15   ;;  %s1210_s14 = sphi %s1258_s14, %s1637_s14   ;;  %s1206_s13 = sphi %s1256_s13, %s1636_s13   ;;  %s1202_s12 = sphi %s1254_s12, %s1635_s12  }
   0x8   : > { %p54_p0 = scmp.ne.s32.totalorder %s1206_s13, %s1202_s12  ;;  %p1288_p1 = scmp.eq.s32.totalorder %s885_s18, 0 }
   0x9   : > { %p1292_p2 = scmp.eq.s32.totalorder %s885_s18, 1  ;;  %p128_p3 = scmp.eq.s32.totalorder %s886_s19, 1 }
   0xa   : > { %s1620_s20 = scalar_select %p1288_p1, 1, 0 }
   0xb   : > { %s1621_s21 = scalar_select %p1292_p2, 1, 0 }
   0xc   : > { %p1298_p4 = por %p1288_p1, %p54_p0  ;;  %p887_p5 = scmp.ge.s32.totalorder %s1222_s17, 1 }
   0xd   : > { %p1303_p6 = por %p128_p3, %p54_p0  ;;  %p135_p7 = scmp.lt.s32.totalorder %s1222_s17, 3 }
   0xe   : > { %s1622_s22 = scalar_select %p1298_p4, 1, 0 }
   0xf   : > { %s1623_s23 = scalar_select %p1303_p6, 1, 0 }
  0x10   : > { %p1308_p8 = pnand %p887_p5, %p135_p7  ;;  %s1224_s25 = smov [#allocation5]  }
  0x11   : > { %s147_s26 = sshll.u32 %s1224_s25, 4  ;;  %s32_s28 = sadd.s32 1, %s1218_s16  ;;  %s148_s26 = int_to_ptr.vmem [resolvable:$true] %s147_s26 }
  0x12   : > { %s1624_s24 = scalar_select %p1308_p8, 1, 0 }
  0x13   : > { %p1000_p9 = pneg %p1308_p8  ;;  %s1078_s4 = scalar_lea.hbm %s1613_s1, 512 }
  0x14   : > { %p1079_p12 = scmp.ne.s32.totalorder %s1613_s1, %s1078_s4  ;;  %p1085_p5 = scmp.lt.u32.totalorder %s1078_s4, %s1613_s1 }
  0x15   : > { %p1317_p11 = pnand %p1000_p9, %p1288_p1 }
  0x17   : > { %p1080_p13 = pneg %p1317_p11 }
  0x19   : > { %p1081_p0 = pnand %p1080_p13, %p1079_p12 }
  0x1b   : > { %p1082_p3 = pneg %p1081_p0 }
  0x1d   : > { %p1087_p7 = pnand %p1085_p5, %p1082_p3 }
  0x1f   : > { %1090 = shalt.err (!%p1087_p7)
}
  0x20   : > { %s1091_s9 = scalar_lea.vmem %s148_s26, 512  ;;  %p1099_p1 = scmp.lt.s32.totalorder %s148_s26, %s148_s26 }
  0x21   : > { %p1092_p9 = scmp.ne.s32.totalorder %s148_s26, %s1091_s9  ;;  %p1100_p4 = scmp.lt.s32.totalorder %s1091_s9, %s1091_s9 }
  0x23   : > { %p1094_p10 = pnand %p1092_p9, %p1080_p13  ;;  %p1101_p8 = por %p1100_p4, %p1099_p1 }
  0x25   : > { %p1095_p6 = pneg %p1094_p10 }
  0x27   : > { %p1102_p2 = pnand %p1101_p8, %p1095_p6 }
  0x29   : > { %1105 = shalt.err (!%p1102_p2)
}
  0x2a   : > { %s1225_s10 = smov 128   ;;  %s1226_s11 = smov 8  }
  0x2b   : > { %1003 = dma.hbm_to_vmem [thread:$0]  (!%p1317_p11), %s1613_s1, 512, %s148_s26, [#allocation6], %s1225_s10, %s1225_s10, %s1226_s11  }
  0x2c   : > { %p34_p1 = scmp.ge.s32.totalorder %s32_s28, 2  ;;  %s41_s25 = sadd.s32 1, %s1210_s14 }
  0x2d   : > { %p48_p2 = scmp.ne.s32.totalorder %s1210_s14, %s1206_s13  ;;  %p49_p4 = scmp.eq.s32.totalorder %s1222_s17, 0 }
  0x2e   : > { %s1641_s28 = smov (%p34_p1, %s32_s28), 0  ;;  %p1627_p8 = scmp.ne.s32.totalorder %s1621_s21, 0 }
  0x2f   : > { %p1344_p6 = por %p49_p4, %p48_p2  ;;  %s36_s27 = ssub.s32 %s1218_s16, %s1641_s28 }
  0x30   : > { %p1350_p10 = por %p1627_p8, %p48_p2  ;;  %p1013_p12 = scmp.lt.s32.totalorder %s1222_s17, 2 }
  0x31   : > { %p39_p11 = scmp.eq.s32.totalorder %s36_s27, 0  ;;  %s164_s26 = sand.u32 1, %s1210_s14  }
  0x32   : > { %s890_s4 = sshll.u32 %s164_s26, 6  ;;  %s954_s6 = sshll.u32 %s1218_s16, 10 }
  0x33   : > { %s1359_s5 = scalar_select %p39_p11, %s1210_s14, %s41_s25  }
  0x34   : > { %s1365_s9 = scalar_lea.hbm %s1612_s0, %s954_s6  ;;  %s168_s21 = scalar_lea.vmem [#allocation2], %s890_s4 }
  0x35   : > { %s177_s10 = sshll.u32 %s168_s21, 4  ;;  %p1371_p13 = pnand %p1013_p12, %p1344_p6  ;;  %s1367_s10 = int_to_ptr.vmem [resolvable:$true] %s177_s10 }
  0x36   : > { %s1375_s18 = scalar_lea.sflag [#allocation3], %s164_s26  ;;  %s1106_s19 = scalar_lea.hbm %s1365_s9, 1024 }
  0x37   : > { %p1107_p0 = scmp.ne.s32.totalorder %s1365_s9, %s1106_s19  ;;  %p1108_p3 = pneg %p1371_p13 }
  0x38   : > { %s1111_s29 = scalar_lea.hbm %s1612_s0, 2048  ;;  %p1112_p9 = scmp.lt.u32.totalorder %s1365_s9, %s1612_s0 }
  0x39   : > { %p1109_p5 = pnand %p1108_p3, %p1107_p0  ;;  %p1113_p1 = scmp.lt.u32.totalorder %s1111_s29, %s1106_s19 }
  0x3a   : > { %p1115_p4 = scmp.lt.u32.totalorder %s1106_s19, %s1365_s9 }
  0x3b   : > { %p1110_p7 = pneg %p1109_p5  ;;  %p1114_p2 = por %p1113_p1, %p1112_p9 }
  0x3d   : > { %p1116_p6 = por %p1115_p4, %p1114_p2 }
  0x3f   : > { %p1117_p8 = pnand %p1116_p6, %p1110_p7 }
  0x41   : > { %1120 = shalt.err (!%p1117_p8)
}
  0x42   : > { %s1121_s26 = scalar_lea.vmem %s1367_s10, 1024  ;;  %s1227_s7 = smov [#allocation2]  }
  0x43   : > { %p1122_p12 = scmp.ne.s32.totalorder %s1367_s10, %s1121_s26  ;;  %s1126_s8 = sshll.u32 %s1227_s7, 4  ;;  %s1127_s8 = int_to_ptr.vmem [resolvable:$false] %s1126_s8 }
  0x44   : > { %s1128_s21 = scalar_lea.vmem %s1127_s8, 2048  ;;  %p1129_p5 = scmp.lt.s32.totalorder %s1367_s10, %s1127_s8 }
  0x45   : > { %p1124_p11 = pnand %p1122_p12, %p1108_p3  ;;  %p1130_p9 = scmp.lt.s32.totalorder %s1128_s21, %s1121_s26 }
  0x47   : > { %p1125_p0 = pneg %p1124_p11  ;;  %p1131_p1 = por %p1130_p9, %p1129_p5 }
  0x49   : > { %p1132_p2 = pnand %p1131_p1, %p1125_p0 }
  0x4b   : > { %1135 = shalt.err (!%p1132_p2)
}
  0x4c   : > { %s1228_s19 = smov 256   ;;  %s1229_s25 = smov 16  }
  0x4d   : > { %1007 = dma.hbm_to_vmem [thread:$0]  (!%p1371_p13), %s1365_s9, 1024, %s1367_s10, %s1375_s18, %s1228_s19, %s1228_s19, %s1229_s25  }
  0x4e   : > { %p1630_p3 = scmp.ne.s32.totalorder %s1624_s24, 0 }
  0x4f   : > { %s1406_s27 = sand.u32 (!%p1630_p3), 1, %s1206_s13   ;;  %p1631_p7 = scmp.ne.s32.totalorder (!%p1630_p3), %s1622_s22, 0 }
  0x50   : > { %189 = sbr.rel (%p1630_p3) target bundleno = 488 (0x1e8), region = 32  ;;  %s894_s29 = sshll.u32 (!%p1630_p3), %s1406_s27, 6 }
  0x51   : > { %s192_s4 = scalar_lea.sflag (!%p1630_p3), [#allocation3], %s1406_s27  ;;  %s195_s6 = scalar_lea.vmem (!%p1630_p3), [#allocation2], %s894_s29 }
  0x57   : > { %1189 = dma.done.wait (%p1631_p7), %s192_s4, 1024  }
  0x58   : > { %1191 = vsyncadd (%p1631_p7), %s192_s4, 4294966272  ;;  %p1632_p4 = scmp.ne.s32.totalorder %s1620_s20, 0 }
  0x5a   : > { %1193 = dma.done.wait (%p1632_p4), [#allocation6], 512  }
  0x5b   : > { %1195 = vsyncadd (%p1632_p4), [#allocation6], 4294966784  ;;  %v1230_v0 = vmov 0   ;;  %v226_v1 = vld [vmem:[%s195_s6 + $0x8] sm:$0xff]  ;;  %v228_v2 = vld [vmem:[%s195_s6 + $0x18] sm:$0xff]  ;;  %vm305_vm0 = vcmask 261120   ;;  %v243_v33 = vlaneseq }
  0x5c   : > { %386 = vmatprep.mubr.bf16.mxu0 %v1230_v0  ;;  %466 = vmatprep.mubr.bf16.mxu1 %v1230_v0  ;;  %v225_v3 = vld [vmem:[%s195_s6] sm:$0xff]  ;;  %v234_v4 = vpack.c.bf16 %v228_v2, %v226_v1  ;;  %v227_v5 = vld [vmem:[%s195_s6 + $0x10] sm:$0xff]  ;;  %v230_v6 = vld [vmem:[%s195_s6 + $0x28] sm:$0xff]  ;;  %s896_s24 = sshll.u32 %s1406_s27, 8  ;;  %s987_s10 = sshll.u32 %s1214_s15, 12 }
  0x5d   : > { %v232_v7 = vld [vmem:[%s195_s6 + $0x38] sm:$0xff]  ;;  %v233_v8 = vpack.c.bf16 %v227_v5, %v225_v3  ;;  %v229_v9 = vld [vmem:[%s195_s6 + $0x20] sm:$0xff]  ;;  %v231_v10 = vld [vmem:[%s195_s6 + $0x30] sm:$0xff]  ;;  %v244_v34 = vshrl.u32 %v243_v33, 7  ;;  %s1466_s9 = scalar_lea.vmem [#allocation7], %s896_s24  ;;  %s1558_s7 = scalar_lea.hbm %s1615_s3, %s987_s10 }
  0x5e   : > { %269 = vxpose.xlu1.c.b16.start [1/2] (short) %v234_v4, 128  ;;  %v236_v11 = vpack.c.bf16 %v232_v7, %v230_v6  ;;  %v1072_v12 = vld [vmem:[#allocation5 + $0x4] ss:$8 sps:$4 sm:$0xff]   ;;  %v1074_v13 = vld [vmem:[#allocation5] ss:$8 sps:$4 sm:$0xff]   ;;  %v235_v14 = vpack.c.bf16 %v231_v10, %v229_v9  ;;  %v1075_v15 = vld [vmem:[#allocation5 + $0x14] ss:$8 sps:$4 sm:$0xff]  }
  0x5f   : > { %253 = vxpose.xlu0.c.b16.start [1/2] (short) %v233_v8, 128  ;;  %354 = vmatprep.subr.bf16.mxu0 %v1072_v12  ;;  %v1077_v16 = vld [vmem:[#allocation5 + $0x10] ss:$8 sps:$4 sm:$0xff]   ;;  %v245_v35 = vsub.s32 0, %v244_v34  ;;  %v241_v36 = vld [vmem:[%s1614_s2] sm:$0x3]  ;;  %v249_v37 = vsub.s32 1, %v244_v34 }
  0x60   : > { %988 = vmatprep.subr.bf16.mxu1 %v1072_v12  ;;  %355 = vmatpush1.bf16.msra.mxu0 %v1074_v13  ;;  %s788_s11 = sshll.u32 %s1466_s9, 4  ;;  %s772_s15 = scalar_lea.sflag [#allocation4], %s1406_s27  ;;  %s1560_s11 = int_to_ptr.vmem [resolvable:$true] %s788_s11 }
  0x61   : > { %990 = vmatpush1.bf16.msra.mxu1 %v1074_v13  ;;  %356 = vmatprep.subr.bf16.mxu0 %v1075_v15  ;;  %v1453_v38 = vrot.slane %v241_v36, %v245_v35  ;;  %v1455_v39 = vrot.slane %v241_v36, %v249_v37  ;;  %s1136_s8 = scalar_lea.vmem %s1560_s11, 4096  ;;  %s1231_s21 = smov [#allocation7]  }
  0x62   : > { %270 = vxpose.xlu1.c.b16.end [2/2] (short) %v236_v11, 128  ;;  %989 = vmatprep.subr.bf16.mxu1 %v1075_v15  ;;  %p1137_p13 = scmp.ne.s32.totalorder %s1560_s11, %s1136_s8  ;;  %s1140_s19 = sshll.u32 %s1231_s21, 4  ;;  %s1141_s19 = int_to_ptr.vmem [resolvable:$false] %s1140_s19 }
  0x63   : > { %254 = vxpose.xlu0.c.b16.end [2/2] (short) %v235_v14, 128  ;;  %s1142_s25 = scalar_lea.vmem %s1141_s19, 8192  ;;  %p1143_p12 = scmp.lt.s32.totalorder %s1560_s11, %s1141_s19 }
  0x64   : > { %357 = vmatpush1.bf16.msra.mxu0 %v1077_v16  ;;  %p1138_p6 = pnand %p1137_p13, %p1350_p10  ;;  %p1144_p11 = scmp.lt.s32.totalorder %s1142_s25, %s1136_s8 }
  0x65   : > { %991 = vmatpush1.bf16.msra.mxu1 %v1077_v16 }
  0x66   : > { %p1139_p8 = pneg %p1138_p6  ;;  %p1145_p0 = por %p1144_p11, %p1143_p12 }
  0x68   : > { %p1146_p5 = pnand %p1145_p0, %p1139_p8 }
  0xc4   : > { %v277_v17 = vpop.trf.xlu1 }
  0xc5   : > { %v261_v18 = vpop.trf.xlu0  ;;  %909 = vmatmul.mubr.msk.bf16.vlgmr.msra.gmra.mrb[0].mxu1 %vm305_vm0, %v277_v17 }
  0xc6   : > { %901 = vmatmul.mubr.msk.bf16.vlgmr.msra.gmra.mrb[0].mxu0 %vm305_vm0, %v261_v18  ;;  %476 = vmatprep.mubr.bf16.mxu1 %v1230_v0 }
  0xc7   : > { %396 = vmatprep.mubr.bf16.mxu0 %v1230_v0 }
  0xc8   : > { %v278_v19 = vpop.trf.xlu1 }
  0xc9   : > { %v262_v20 = vpop.trf.xlu0 }
  0xcc   : > { %v279_v21 = vpop.trf.xlu1 }
  0xcd   : > { %910 = vmatmul.mubr.msk.bf16.gmra.mrb[4].mxu1 %vm305_vm0, %v278_v19  ;;  %v263_v22 = vpop.trf.xlu0 }
  0xce   : > { %902 = vmatmul.mubr.msk.bf16.gmra.mrb[4].mxu0 %vm305_vm0, %v262_v20  ;;  %486 = vmatprep.mubr.bf16.mxu1 %v1230_v0 }
  0xcf   : > { %406 = vmatprep.mubr.bf16.mxu0 %v1230_v0 }
  0xd0   : > { %v280_v23 = vpop.trf.xlu1 }
  0xd1   : > { %v264_v24 = vpop.trf.xlu0 }
  0xd4   : > { %v281_v25 = vpop.trf.xlu1 }
  0xd5   : > { %911 = vmatmul.mubr.msk.bf16.gmra.mrb[8].mxu1 %vm305_vm0, %v279_v21  ;;  %v265_v26 = vpop.trf.xlu0 }
  0xd6   : > { %903 = vmatmul.mubr.msk.bf16.gmra.mrb[8].mxu0 %vm305_vm0, %v263_v22  ;;  %496 = vmatprep.mubr.bf16.mxu1 %v1230_v0 }
  0xd7   : > { %416 = vmatprep.mubr.bf16.mxu0 %v1230_v0 }
  0xd8   : > { %v282_v27 = vpop.trf.xlu1 }
  0xd9   : > { %v266_v28 = vpop.trf.xlu0 }
  0xdc   : > { %v283_v29 = vpop.trf.xlu1 }
  0xdd   : > { %912 = vmatmul.mubr.msk.bf16.gmra.mrb[12].mxu1 %vm305_vm0, %v280_v23  ;;  %v267_v30 = vpop.trf.xlu0 }
  0xde   : > { %904 = vmatmul.mubr.msk.bf16.gmra.mrb[12].mxu0 %vm305_vm0, %v264_v24  ;;  %506 = vmatprep.mubr.bf16.mxu1 %v1230_v0 }
  0xdf   : > { %426 = vmatprep.mubr.bf16.mxu0 %v1230_v0 }
  0xe0   : > { %v284_v31 = vpop.trf.xlu1 }
  0xe1   : > { %v268_v32 = vpop.trf.xlu0 }
  0xe5   : > { %913 = vmatmul.mubr.msk.bf16.gmra.mrb[16].mxu1 %vm305_vm0, %v281_v25 }
  0xe6   : > { %905 = vmatmul.mubr.msk.bf16.gmra.mrb[16].mxu0 %vm305_vm0, %v265_v26  ;;  %516 = vmatprep.mubr.bf16.mxu1 %v1230_v0 }
  0xe7   : > { %436 = vmatprep.mubr.bf16.mxu0 %v1230_v0 }
  0xed   : > { %914 = vmatmul.mubr.msk.bf16.gmra.mrb[20].mxu1 %vm305_vm0, %v282_v27 }
  0xee   : > { %906 = vmatmul.mubr.msk.bf16.gmra.mrb[20].mxu0 %vm305_vm0, %v266_v28  ;;  %526 = vmatprep.mubr.bf16.mxu1 %v1230_v0 }
  0xef   : > { %446 = vmatprep.mubr.bf16.mxu0 %v1230_v0 }
  0xf5   : > { %915 = vmatmul.mubr.msk.bf16.gmra.mrb[24].mxu1 %vm305_vm0, %v283_v29 }
  0xf6   : > { %907 = vmatmul.mubr.msk.bf16.gmra.mrb[24].mxu0 %vm305_vm0, %v267_v30  ;;  %536 = vmatprep.mubr.bf16.mxu1 %v1230_v0 }
  0xf7   : > { %456 = vmatprep.mubr.bf16.mxu0 %v1230_v0 }
  0xfd   : > { %916 = vmatmul.mubr.msk.bf16.gmra.mrb[28].mxu1 %vm305_vm0, %v284_v31 }
  0xfe   : > { %908 = vmatmul.mubr.msk.bf16.gmra.mrb[28].mxu0 %vm305_vm0, %v268_v32 }
 0x198   : > { %v468_v40 = vpop.f32.mrb[0].mxu1 }
 0x199   : > { %v388_v41 = vpop.f32.mrb[0].mxu0  ;;  %v469_v42 = vadd.f32 %v468_v40, %v1453_v38  ;;  %v470_v43 = vpop.f32.mrb[1].mxu1 }
 0x19a   : > { %v389_v44 = vadd.f32 %v388_v41, %v1453_v38  ;;  %v390_v45 = vpop.f32.mrb[1].mxu0  ;;  %v471_v46 = vadd.f32 %v470_v43, %v1455_v39  ;;  %v472_v47 = vpop.f32.mrb[2].mxu1 }
 0x19b   : > { %v391_v48 = vadd.f32 %v390_v45, %v1455_v39  ;;  %v392_v49 = vpop.f32.mrb[2].mxu0  ;;  %v473_v50 = vadd.f32 %v472_v47, %v1453_v38  ;;  %v474_v51 = vpop.f32.mrb[3].mxu1 }
 0x19c   : > { %v971_v52 = vpack.c.bf16 %v471_v46, %v469_v42  ;;  %v393_v53 = vadd.f32 %v392_v49, %v1453_v38  ;;  %v394_v54 = vpop.f32.mrb[3].mxu0  ;;  %v475_v55 = vadd.f32 %v474_v51, %v1455_v39 }
 0x19d   : > { %v955_v56 = vpack.c.bf16 %v391_v48, %v389_v44  ;;  %v395_v57 = vadd.f32 %v394_v54, %v1455_v39 }
 0x19e   : > { %755 = vst [vmem:[%s1466_s9 + $0x80] sm:$0xff] %v971_v52  ;;  %v972_v58 = vpack.c.bf16 %v475_v55, %v473_v50 }
 0x19f   : > { %739 = vst [vmem:[%s1466_s9] sm:$0xff] %v955_v56  ;;  %v956_v59 = vpack.c.bf16 %v395_v57, %v393_v53 }
 0x1a0   : > { %756 = vst [vmem:[%s1466_s9 + $0x88] sm:$0xff] %v972_v58  ;;  %v478_v60 = vpop.f32.mrb[4].mxu1 }
 0x1a1   : > { %740 = vst [vmem:[%s1466_s9 + $0x8] sm:$0xff] %v956_v59  ;;  %v398_v61 = vpop.f32.mrb[4].mxu0  ;;  %v479_v62 = vadd.f32 %v478_v60, %v1453_v38  ;;  %v480_v63 = vpop.f32.mrb[5].mxu1 }
 0x1a2   : > { %v399_v0 = vadd.f32 %v398_v61, %v1453_v38  ;;  %v400_v1 = vpop.f32.mrb[5].mxu0  ;;  %v481_v2 = vadd.f32 %v480_v63, %v1455_v39  ;;  %v482_v3 = vpop.f32.mrb[6].mxu1 }
 0x1a3   : > { %v401_v4 = vadd.f32 %v400_v1, %v1455_v39  ;;  %v402_v5 = vpop.f32.mrb[6].mxu0  ;;  %v483_v6 = vadd.f32 %v482_v3, %v1453_v38  ;;  %v484_v7 = vpop.f32.mrb[7].mxu1 }
 0x1a4   : > { %v973_v8 = vpack.c.bf16 %v481_v2, %v479_v62  ;;  %v403_v9 = vadd.f32 %v402_v5, %v1453_v38  ;;  %v404_v10 = vpop.f32.mrb[7].mxu0  ;;  %v485_v11 = vadd.f32 %v484_v7, %v1455_v39 }
 0x1a5   : > { %v957_v12 = vpack.c.bf16 %v401_v4, %v399_v0  ;;  %v405_v13 = vadd.f32 %v404_v10, %v1455_v39 }
 0x1a6   : > { %757 = vst [vmem:[%s1466_s9 + $0x90] sm:$0xff] %v973_v8  ;;  %v974_v14 = vpack.c.bf16 %v485_v11, %v483_v6 }
 0x1a7   : > { %741 = vst [vmem:[%s1466_s9 + $0x10] sm:$0xff] %v957_v12  ;;  %v958_v15 = vpack.c.bf16 %v405_v13, %v403_v9 }
 0x1a8   : > { %758 = vst [vmem:[%s1466_s9 + $0x98] sm:$0xff] %v974_v14  ;;  %v488_v16 = vpop.f32.mrb[8].mxu1 }
 0x1a9   : > { %742 = vst [vmem:[%s1466_s9 + $0x18] sm:$0xff] %v958_v15  ;;  %v408_v17 = vpop.f32.mrb[8].mxu0  ;;  %v489_v18 = vadd.f32 %v488_v16, %v1453_v38  ;;  %v490_v19 = vpop.f32.mrb[9].mxu1 }
 0x1aa   : > { %v409_v20 = vadd.f32 %v408_v17, %v1453_v38  ;;  %v410_v21 = vpop.f32.mrb[9].mxu0  ;;  %v491_v22 = vadd.f32 %v490_v19, %v1455_v39  ;;  %v492_v23 = vpop.f32.mrb[10].mxu1 }
 0x1ab   : > { %v411_v24 = vadd.f32 %v410_v21, %v1455_v39  ;;  %v412_v25 = vpop.f32.mrb[10].mxu0  ;;  %v493_v26 = vadd.f32 %v492_v23, %v1453_v38  ;;  %v494_v27 = vpop.f32.mrb[11].mxu1 }
 0x1ac   : > { %v975_v28 = vpack.c.bf16 %v491_v22, %v489_v18  ;;  %v413_v29 = vadd.f32 %v412_v25, %v1453_v38  ;;  %v414_v30 = vpop.f32.mrb[11].mxu0  ;;  %v495_v31 = vadd.f32 %v494_v27, %v1455_v39 }
 0x1ad   : > { %v959_v32 = vpack.c.bf16 %v411_v24, %v409_v20  ;;  %v415_v33 = vadd.f32 %v414_v30, %v1455_v39 }
 0x1ae   : > { %759 = vst [vmem:[%s1466_s9 + $0xa0] sm:$0xff] %v975_v28  ;;  %v976_v34 = vpack.c.bf16 %v495_v31, %v493_v26 }
 0x1af   : > { %743 = vst [vmem:[%s1466_s9 + $0x20] sm:$0xff] %v959_v32  ;;  %v960_v35 = vpack.c.bf16 %v415_v33, %v413_v29 }
 0x1b0   : > { %760 = vst [vmem:[%s1466_s9 + $0xa8] sm:$0xff] %v976_v34  ;;  %v498_v36 = vpop.f32.mrb[12].mxu1 }
 0x1b1   : > { %744 = vst [vmem:[%s1466_s9 + $0x28] sm:$0xff] %v960_v35  ;;  %v418_v37 = vpop.f32.mrb[12].mxu0  ;;  %v499_v40 = vadd.f32 %v498_v36, %v1453_v38  ;;  %v500_v41 = vpop.f32.mrb[13].mxu1 }
 0x1b2   : > { %v419_v42 = vadd.f32 %v418_v37, %v1453_v38  ;;  %v420_v43 = vpop.f32.mrb[13].mxu0  ;;  %v501_v44 = vadd.f32 %v500_v41, %v1455_v39  ;;  %v502_v45 = vpop.f32.mrb[14].mxu1 }
 0x1b3   : > { %v421_v46 = vadd.f32 %v420_v43, %v1455_v39  ;;  %v422_v47 = vpop.f32.mrb[14].mxu0  ;;  %v503_v48 = vadd.f32 %v502_v45, %v1453_v38  ;;  %v504_v49 = vpop.f32.mrb[15].mxu1 }
 0x1b4   : > { %v977_v50 = vpack.c.bf16 %v501_v44, %v499_v40  ;;  %v423_v51 = vadd.f32 %v422_v47, %v1453_v38  ;;  %v424_v52 = vpop.f32.mrb[15].mxu0  ;;  %v505_v53 = vadd.f32 %v504_v49, %v1455_v39 }
 0x1b5   : > { %v961_v54 = vpack.c.bf16 %v421_v46, %v419_v42  ;;  %v425_v55 = vadd.f32 %v424_v52, %v1455_v39 }
 0x1b6   : > { %761 = vst [vmem:[%s1466_s9 + $0xb0] sm:$0xff] %v977_v50  ;;  %v978_v56 = vpack.c.bf16 %v505_v53, %v503_v48 }
 0x1b7   : > { %745 = vst [vmem:[%s1466_s9 + $0x30] sm:$0xff] %v961_v54  ;;  %v962_v57 = vpack.c.bf16 %v425_v55, %v423_v51 }
 0x1b8   : > { %762 = vst [vmem:[%s1466_s9 + $0xb8] sm:$0xff] %v978_v56  ;;  %v508_v58 = vpop.f32.mrb[16].mxu1 }
 0x1b9   : > { %746 = vst [vmem:[%s1466_s9 + $0x38] sm:$0xff] %v962_v57  ;;  %v428_v59 = vpop.f32.mrb[16].mxu0  ;;  %v509_v60 = vadd.f32 %v508_v58, %v1453_v38  ;;  %v510_v61 = vpop.f32.mrb[17].mxu1 }
 0x1ba   : > { %v429_v62 = vadd.f32 %v428_v59, %v1453_v38  ;;  %v430_v63 = vpop.f32.mrb[17].mxu0  ;;  %v511_v0 = vadd.f32 %v510_v61, %v1455_v39  ;;  %v512_v1 = vpop.f32.mrb[18].mxu1 }
 0x1bb   : > { %v431_v2 = vadd.f32 %v430_v63, %v1455_v39  ;;  %v432_v3 = vpop.f32.mrb[18].mxu0  ;;  %v513_v4 = vadd.f32 %v512_v1, %v1453_v38  ;;  %v514_v5 = vpop.f32.mrb[19].mxu1 }
 0x1bc   : > { %v979_v6 = vpack.c.bf16 %v511_v0, %v509_v60  ;;  %v433_v7 = vadd.f32 %v432_v3, %v1453_v38  ;;  %v434_v8 = vpop.f32.mrb[19].mxu0  ;;  %v515_v9 = vadd.f32 %v514_v5, %v1455_v39 }
 0x1bd   : > { %v963_v10 = vpack.c.bf16 %v431_v2, %v429_v62  ;;  %v435_v11 = vadd.f32 %v434_v8, %v1455_v39 }
 0x1be   : > { %763 = vst [vmem:[%s1466_s9 + $0xc0] sm:$0xff] %v979_v6  ;;  %v980_v12 = vpack.c.bf16 %v515_v9, %v513_v4 }
 0x1bf   : > { %747 = vst [vmem:[%s1466_s9 + $0x40] sm:$0xff] %v963_v10  ;;  %v964_v13 = vpack.c.bf16 %v435_v11, %v433_v7 }
 0x1c0   : > { %764 = vst [vmem:[%s1466_s9 + $0xc8] sm:$0xff] %v980_v12  ;;  %v518_v14 = vpop.f32.mrb[20].mxu1 }
 0x1c1   : > { %748 = vst [vmem:[%s1466_s9 + $0x48] sm:$0xff] %v964_v13  ;;  %v438_v15 = vpop.f32.mrb[20].mxu0  ;;  %v519_v16 = vadd.f32 %v518_v14, %v1453_v38  ;;  %v520_v17 = vpop.f32.mrb[21].mxu1 }
 0x1c2   : > { %v439_v18 = vadd.f32 %v438_v15, %v1453_v38  ;;  %v440_v19 = vpop.f32.mrb[21].mxu0  ;;  %v521_v20 = vadd.f32 %v520_v17, %v1455_v39  ;;  %v522_v21 = vpop.f32.mrb[22].mxu1 }
 0x1c3   : > { %v441_v22 = vadd.f32 %v440_v19, %v1455_v39  ;;  %v442_v23 = vpop.f32.mrb[22].mxu0  ;;  %v523_v24 = vadd.f32 %v522_v21, %v1453_v38  ;;  %v524_v25 = vpop.f32.mrb[23].mxu1 }
 0x1c4   : > { %v981_v26 = vpack.c.bf16 %v521_v20, %v519_v16  ;;  %v443_v27 = vadd.f32 %v442_v23, %v1453_v38  ;;  %v444_v28 = vpop.f32.mrb[23].mxu0  ;;  %v525_v29 = vadd.f32 %v524_v25, %v1455_v39 }
 0x1c5   : > { %v965_v30 = vpack.c.bf16 %v441_v22, %v439_v18  ;;  %v445_v31 = vadd.f32 %v444_v28, %v1455_v39 }
 0x1c6   : > { %765 = vst [vmem:[%s1466_s9 + $0xd0] sm:$0xff] %v981_v26  ;;  %v982_v32 = vpack.c.bf16 %v525_v29, %v523_v24 }
 0x1c7   : > { %749 = vst [vmem:[%s1466_s9 + $0x50] sm:$0xff] %v965_v30  ;;  %v966_v33 = vpack.c.bf16 %v445_v31, %v443_v27 }
 0x1c8   : > { %766 = vst [vmem:[%s1466_s9 + $0xd8] sm:$0xff] %v982_v32  ;;  %v528_v34 = vpop.f32.mrb[24].mxu1 }
 0x1c9   : > { %750 = vst [vmem:[%s1466_s9 + $0x58] sm:$0xff] %v966_v33  ;;  %v448_v35 = vpop.f32.mrb[24].mxu0  ;;  %v529_v36 = vadd.f32 %v528_v34, %v1453_v38  ;;  %v530_v37 = vpop.f32.mrb[25].mxu1 }
 0x1ca   : > { %v449_v40 = vadd.f32 %v448_v35, %v1453_v38  ;;  %v450_v41 = vpop.f32.mrb[25].mxu0  ;;  %v531_v42 = vadd.f32 %v530_v37, %v1455_v39  ;;  %v532_v43 = vpop.f32.mrb[26].mxu1 }
 0x1cb   : > { %v451_v44 = vadd.f32 %v450_v41, %v1455_v39  ;;  %v452_v45 = vpop.f32.mrb[26].mxu0  ;;  %v533_v46 = vadd.f32 %v532_v43, %v1453_v38  ;;  %v534_v47 = vpop.f32.mrb[27].mxu1 }
 0x1cc   : > { %v983_v48 = vpack.c.bf16 %v531_v42, %v529_v36  ;;  %v453_v49 = vadd.f32 %v452_v45, %v1453_v38  ;;  %v454_v50 = vpop.f32.mrb[27].mxu0  ;;  %v535_v51 = vadd.f32 %v534_v47, %v1455_v39 }
 0x1cd   : > { %v967_v52 = vpack.c.bf16 %v451_v44, %v449_v40  ;;  %v455_v53 = vadd.f32 %v454_v50, %v1455_v39 }
 0x1ce   : > { %767 = vst [vmem:[%s1466_s9 + $0xe0] sm:$0xff] %v983_v48  ;;  %v984_v54 = vpack.c.bf16 %v535_v51, %v533_v46 }
 0x1cf   : > { %751 = vst [vmem:[%s1466_s9 + $0x60] sm:$0xff] %v967_v52  ;;  %v968_v55 = vpack.c.bf16 %v455_v53, %v453_v49 }
 0x1d0   : > { %768 = vst [vmem:[%s1466_s9 + $0xe8] sm:$0xff] %v984_v54  ;;  %v538_v56 = vpop.f32.mrb[28].mxu1 }
 0x1d1   : > { %752 = vst [vmem:[%s1466_s9 + $0x68] sm:$0xff] %v968_v55  ;;  %v458_v57 = vpop.f32.mrb[28].mxu0  ;;  %v539_v58 = vadd.f32 %v538_v56, %v1453_v38  ;;  %v540_v59 = vpop.f32.mrb[29].mxu1 }
 0x1d2   : > { %v459_v60 = vadd.f32 %v458_v57, %v1453_v38  ;;  %v460_v61 = vpop.f32.mrb[29].mxu0  ;;  %v541_v62 = vadd.f32 %v540_v59, %v1455_v39  ;;  %v542_v63 = vpop.f32.mrb[30].mxu1 }
 0x1d3   : > { %v461_v0 = vadd.f32 %v460_v61, %v1455_v39  ;;  %v462_v1 = vpop.f32.mrb[30].mxu0  ;;  %v543_v2 = vadd.f32 %v542_v63, %v1453_v38  ;;  %v544_v3 = vpop.f32.mrb[31].mxu1 }
 0x1d4   : > { %v985_v4 = vpack.c.bf16 %v541_v62, %v539_v58  ;;  %v463_v5 = vadd.f32 %v462_v1, %v1453_v38  ;;  %v464_v6 = vpop.f32.mrb[31].mxu0  ;;  %v545_v7 = vadd.f32 %v544_v3, %v1455_v39 }
 0x1d5   : > { %v969_v8 = vpack.c.bf16 %v461_v0, %v459_v60  ;;  %v465_v9 = vadd.f32 %v464_v6, %v1455_v39 }
 0x1d6   : > { %769 = vst [vmem:[%s1466_s9 + $0xf0] sm:$0xff] %v985_v4  ;;  %v986_v10 = vpack.c.bf16 %v545_v7, %v543_v2 }
 0x1d7   : > { %753 = vst [vmem:[%s1466_s9 + $0x70] sm:$0xff] %v969_v8  ;;  %v970_v38 = vpack.c.bf16 %v465_v9, %v463_v5 }
 0x1d8   : > { %770 = vst [vmem:[%s1466_s9 + $0xf8] sm:$0xff] %v986_v10 }
 0x1d9   : > { %754 = vst [vmem:[%s1466_s9 + $0x78] sm:$0xff] %v970_v38 }
 0x1da   : > { %1149 = shalt.err (!%p1146_p5)
}
 0x1db   : > { %s1150_s29 = scalar_lea.hbm %s1558_s7, 4096  ;;  %s1154_s20 = scalar_lea.hbm %s1615_s3, 8192 }
 0x1dc   : > { %p1151_p9 = scmp.ne.s32.totalorder %s1558_s7, %s1150_s29  ;;  %p1155_p3 = scmp.lt.u32.totalorder %s1558_s7, %s1615_s3 }
 0x1dd   : > { %p1156_p7 = scmp.lt.u32.totalorder %s1154_s20, %s1150_s29  ;;  %p1158_p13 = scmp.lt.u32.totalorder %s1150_s29, %s1558_s7 }
 0x1de   : > { %p1152_p1 = pnand %p1151_p9, %p1350_p10 }
 0x1df   : > { %p1157_p4 = por %p1156_p7, %p1155_p3 }
 0x1e0   : > { %p1153_p2 = pneg %p1152_p1 }
 0x1e1   : > { %p1159_p6 = por %p1158_p13, %p1157_p4 }
 0x1e3   : > { %p1160_p8 = pnand %p1159_p6, %p1153_p2 }
 0x1e5   : > { %1163 = shalt.err (!%p1160_p8)
}
 0x1e6   : > { %s1232_s9 = smov 128   ;;  %s1233_s10 = smov 8  }
 0x1e7   : > { %998 = dma.vmem_to_hbm [thread:$0]  (%p1350_p10), %s1560_s11, 4096, %s1558_s7, %s772_s15, %s1232_s9, %s1232_s9, %s1233_s10  }
 0x1e8 PF: > { %s803_s18 = sand.u32 1, %s1202_s12   ;;  %p1633_p12 = scmp.ne.s32.totalorder %s1623_s23, 0 }
 0x1e9   : > { %p1634_p11 = scmp.ge.s32.totalorder %s1222_s17, 2  ;;  %s804_s26 = scalar_lea.sflag [#allocation4], %s803_s18 }
 0x1eb   : > { %p1009_p0 = pnand %p1634_p11, %p1633_p12 }
 0x1ed   : > { %1197 = dma.done.wait (!%p1009_p0), %s804_s26, 4096  }
 0x1ee   : > { %1199 = vsyncadd (!%p1009_p0), %s804_s26, 4294963200  ;;  %s20_s17 = sadd.s32 1, %s1222_s17   ;;  %s1635_s12 = smov %s1206_s13 }
 0x1ef   : > { %p17_p5 = scmp.ge.s32.totalorder %s20_s17, 4   ;;  %s1636_s13 = smov %s1210_s14 }
 0x1f0   : > { %s1637_s14 = smov %s1359_s5  ;;  %s1638_s15 = smov %s1218_s16 }
 0x1f1   : > { %s1639_s16 = smov %s1641_s28  ;;  %19 = sbr.rel (!%p17_p5) target bundleno = 7 (0x7), region = 81 }
 0x1f8   :  { %809 = vsyncpa [#allocation3], 1 }
 0x1f9   :  { %811 = vsyncpa [#allocation3 + $0x1], 1 }
 0x1fa   :  { %812 = vsyncpa [#allocation6], 1 }
 0x1fb   :  { %813 = vsyncpa [#allocation4], 1 }
 0x1fc   :  { %815 = vsyncpa [#allocation4 + $0x1], 1 }

</bundles_post_ra>
